<compile_context>
chip_gen: v6e
topology: v6e:2x2x1
jax: 0.10.0
libtpu: 0.0.40
codegen_flags: <defaults>
</compile_context>

<pallas_src>
import functools

import jax
import jax.numpy as jnp
from jax import lax
from jax.experimental import pallas as pl
from jax.experimental.pallas import tpu as pltpu

LEAKY_SLOPE = 0.01   # PyTorch LeakyReLU default negative_slope
BN_EPS = 1e-5        # PyTorch BatchNorm1d default eps


def _round_up(x, m):
    return (x + m - 1) // m * m


def _conv_act(x_ref, w_ref, b_ref, *, K, dilation, stride, tile_L, num_l):
    """Conv1d (single folded MXU matmul) + bias + LeakyReLU for the current (n, l) tile.

      x_ref: (1, C_in_p, L_x)        bf16 whole padded sample (resident across L tiles)
      w_ref: (C_out_p, K*C_in_p)     bf16 folded weights
      b_ref: (C_out_p, 1)            f32
    Returns the f32 post-activation tile (C_out_p, tile_L).
    """
    if num_l == 1:
        base = 0                                        # fully static slicing path
    else:
        base = pl.program_id(1) * (tile_L * stride)
        if (tile_L * stride) % 128 == 0:
            base = pl.multiple_of(base, 128)            # lane-aligned dynamic offset hint

    taps = []
    for k in range(K):
        start = base + k * dilation
        if stride == 1:
            taps.append(x_ref[0, :, pl.ds(start, tile_L)])
        else:
            taps.append(x_ref[0, :, pl.ds(start, tile_L, stride)])
    xt = jnp.concatenate(taps, axis=0) if K > 1 else taps[0]   # (K*C_in_p, tile_L)

    acc = jnp.dot(w_ref[...], xt, preferred_element_type=jnp.float32)  # (C_out_p, tile_L)
    acc = acc + b_ref[...]                                             # lane-broadcast bias
    return jnp.where(acc >= 0.0, acc, LEAKY_SLOPE * acc)               # LeakyReLU (f32)


def _conv_stats_kernel(x_ref, w_ref, b_ref, stats_ref, *,
                       K, dilation, stride, L_out, L_out_pad, tile_L, num_l):
    """Pass 1: per-tile per-channel [sum, sumsq] of the post-activation conv output."""
    acc = _conv_act(x_ref, w_ref, b_ref, K=K, dilation=dilation, stride=stride,
                    tile_L=tile_L, num_l=num_l)

    def emit(a):
        stats_ref[0, 0, :, 0:1] = jnp.sum(a, axis=1, keepdims=True)
        stats_ref[0, 0, :, 1:2] = jnp.sum(a * a, axis=1, keepdims=True)

    if L_out_pad == L_out:
        emit(acc)
    else:
        valid_last = L_out - (num_l - 1) * tile_L       # valid columns in the last L tile
        if num_l == 1:
            col = lax.broadcasted_iota(jnp.int32, acc.shape, 1)
            emit(jnp.where(col < valid_last, acc, 0.0))
        else:
            last = num_l - 1

            @pl.when(pl.program_id(1) == last)          # only the last tile pays for masking
            def _():
                col = lax.broadcasted_iota(jnp.int32, acc.shape, 1)
                emit(jnp.where(col < valid_last, acc, 0.0))

            @pl.when(pl.program_id(1) != last)
            def _():
                emit(acc)


def _conv_bn_kernel(x_ref, w_ref, b_ref, p_ref, o_ref, *,
                    K, dilation, stride, tile_L, num_l):
    """Pass 2: recompute conv+bias+LeakyReLU and apply the folded BN affine (lane-dense store)."""
    acc = _conv_act(x_ref, w_ref, b_ref, K=K, dilation=dilation, stride=stride,
                    tile_L=tile_L, num_l=num_l)
    scale = p_ref[:, 0:1]                               # (C_out_p, 1)
    shift = p_ref[:, 1:2]
    o_ref[0, :, :] = (acc * scale + shift).astype(o_ref.dtype)


def _vmem_limit_bytes():
    # ~75% of physical VMEM: ~96 MiB on v5e/v6e (128 MiB), ~48 MiB on v7x (64 MiB/TC).
    try:
        cap = int(pltpu.get_tpu_info().vmem_capacity_bytes)
    except Exception:
        cap = 64 * 1024 * 1024
    return min(cap * 3 // 4, 100 * 1024 * 1024)


def tdnn_pad_forward(x, weight, bias, gamma, beta, *,
                     kernel_size, stride=1, dilation=1, pad=True,
                     matmul_dtype=jnp.bfloat16, max_tile_l=1024):
    """x: (N, C_in, L) f32.  weight: (C_out, C_in, K) PyTorch Conv1d layout.
    Returns (N, C_out, L_out) f32 — same semantics as TDNN_pad.forward in training mode."""
    N, C_in, L = x.shape
    C_out = weight.shape[0]
    K = kernel_size

    # Matches the module exactly: pad_length = (kernel_size - 1) * dilation // 2.
    pad_len = (K - 1) * dilation // 2 if pad else 0
    L_in = L + 2 * pad_len
    L_out = (L_in - dilation * (K - 1) - 1) // stride + 1

    # Sublane-aligned channel padding; lane dim is L everywhere (dense stores for small C).
    C_in_p = _round_up(C_in, 8)
    C_out_p = _round_up(C_out, 8)

    max_tile_l = _round_up(max_tile_l, 128)
    if L_out <= max_tile_l:
        tile_L = _round_up(L_out, 128)                  # always 128-lane aligned
        num_l = 1
    else:
        tile_L = max_tile_l
        num_l = pl.cdiv(L_out, tile_L)
    L_out_pad = tile_L * num_l

    # Input length so that every in-kernel tap window is in-bounds; lane-aligned.
    L_need = (L_out_pad - 1) * stride + (K - 1) * dilation + 1
    L_x = _round_up(max(L_in, L_need), 128)

    x_ext = jnp.pad(
        x, ((0, 0), (0, C_in_p - C_in), (pad_len, L_x - L - pad_len))
    ).astype(matmul_dtype)                                              # (N, C_in_p, L_x)

    # Fold the K taps into the contraction dim: w_folded[co, k*C_in_p + ci] = weight[co, ci, k].
    w_pad = jnp.pad(weight, ((0, C_out_p - C_out), (0, C_in_p - C_in), (0, 0)))
    w_folded = jnp.transpose(w_pad, (0, 2, 1)).reshape(
        C_out_p, K * C_in_p).astype(matmul_dtype)                       # (C_out_p, K*C_in_p)
    b = jnp.pad(bias.astype(jnp.float32),
                (0, C_out_p - C_out)).reshape(C_out_p, 1)               # (C_out_p, 1)

    grid = (N, num_l)
    cparams = pltpu.CompilerParams(
        dimension_semantics=("parallel", "arbitrary"),   # megacore shards the sample axis
        vmem_limit_bytes=_vmem_limit_bytes(),
    )

    x_spec = pl.BlockSpec((1, C_in_p, L_x), lambda n, l: (n, 0, 0))     # 1 DMA per sample
    w_spec = pl.BlockSpec((C_out_p, K * C_in_p), lambda n, l: (0, 0))
    b_spec = pl.BlockSpec((C_out_p, 1), lambda n, l: (0, 0))

    # ---- Pass 1: per-tile BN partial sums only (no activation round trip to HBM) ----
    stats = pl.pallas_call(
        functools.partial(_conv_stats_kernel, K=K, dilation=dilation, stride=stride,
                          L_out=L_out, L_out_pad=L_out_pad, tile_L=tile_L, num_l=num_l),
        out_shape=jax.ShapeDtypeStruct((N, num_l, C_out_p, 2), jnp.float32),
        grid=grid,
        in_specs=[x_spec, w_spec, b_spec],
        out_specs=pl.BlockSpec((1, 1, C_out_p, 2), lambda n, l: (n, l, 0, 0)),
        compiler_params=cparams,
    )(x_ext, w_folded, b)

    # ---- Tiny cross-tile reduction -> per-channel scale/shift (glue; negligible cost) ----
    tot = jnp.sum(stats, axis=(0, 1))                        # (C_out_p, 2)
    count = float(N * L_out)
    mean = tot[:, 0] / count
    # NOTE: E[x^2]-mean^2 in f32 with a clamp at 0; adequate at these problem sizes.
    var = jnp.maximum(tot[:, 1] / count - mean * mean, 0.0)  # biased batch variance
    gamma_p = jnp.pad(gamma.astype(jnp.float32), (0, C_out_p - C_out))
    beta_p = jnp.pad(beta.astype(jnp.float32), (0, C_out_p - C_out))
    scale = gamma_p * lax.rsqrt(var + BN_EPS)
    shift = beta_p - mean * scale
    params = jnp.stack([scale, shift], axis=1)               # (C_out_p, 2)

    # ---- Pass 2: recompute conv+bias+LeakyReLU, apply BN affine, lane-dense f32 store ----
    out_full = pl.pallas_call(
        functools.partial(_conv_bn_kernel, K=K, dilation=dilation, stride=stride,
                          tile_L=tile_L, num_l=num_l),
        out_shape=jax.ShapeDtypeStruct((N, C_out_p, L_out_pad), jnp.float32),
        grid=grid,
        in_specs=[x_spec, w_spec, b_spec,
                  pl.BlockSpec((C_out_p, 2), lambda n, l: (0, 0))],
        out_specs=pl.BlockSpec((1, C_out_p, tile_L), lambda n, l: (n, 0, l)),
        compiler_params=cparams,
    )(x_ext, w_folded, b, params)

    return out_full[:, :C_out, :L_out]                       # NCL, no transpose needed


def _reference(x, weight, bias, gamma, beta, *, kernel_size, stride, dilation,
               pad, matmul_dtype):
    # Mirror the kernel's bf16 quantization of x/w (accumulation stays f32).
    xq = x.astype(matmul_dtype).astype(jnp.float32)
    wq = weight.astype(matmul_dtype).astype(jnp.float32)
    if pad:
        pad_len = (kernel_size - 1) * dilation // 2
        xq = jnp.pad(xq, ((0, 0), (0, 0), (pad_len, pad_len)))
    y = lax.conv_general_dilated(
        xq, wq, window_strides=(stride,), padding="VALID",
        rhs_dilation=(dilation,), dimension_numbers=("NCH", "OIH", "NCH"),
        precision=lax.Precision.HIGHEST)
    y = y + bias[None, :, None]
    y = jnp.where(y >= 0.0, y, LEAKY_SLOPE * y)
    mean = jnp.mean(y, axis=(0, 2), keepdims=True)
    var = jnp.mean((y - mean) ** 2, axis=(0, 2), keepdims=True)
    return (y - mean) * lax.rsqrt(var + BN_EPS) * gamma[None, :, None] + beta[None, :, None]


if __name__ == "__main__":
    # Module config (with_se=False branch).
    input_dim, output_dim = 4, 8
    kernel_size, stride, dilation = 3, 1, 1
    N, L = 2, 16

    key = jax.random.PRNGKey(0)
    kx, kw, kb = jax.random.split(key, 3)
    x = jax.random.normal(kx, (N, input_dim, L), dtype=jnp.float32)
    # Deterministic synthetic Conv1d / BatchNorm1d parameters.
    weight = jax.random.normal(kw, (output_dim, input_dim, kernel_size),
                               dtype=jnp.float32) * 0.1
    bias = jax.random.normal(kb, (output_dim,), dtype=jnp.float32) * 0.1
    gamma = jnp.ones((output_dim,), dtype=jnp.float32)
    beta = jnp.zeros((output_dim,), dtype=jnp.float32)

    out = tdnn_pad_forward(x, weight, bias, gamma, beta,
                           kernel_size=kernel_size, stride=stride,
                           dilation=dilation, pad=True)
    out = jax.block_until_ready(out)

    ref = _reference(x, weight, bias, gamma, beta,
                     kernel_size=kernel_size, stride=stride,
                     dilation=dilation, pad=True, matmul_dtype=jnp.bfloat16)
    assert out.shape == ref.shape == (N, output_dim, L), (out.shape, ref.shape)
    err = float(jnp.max(jnp.abs(out - ref)))
    assert err < 1e-3, f"mismatch vs reference: {err}"
    print("KERNEL_OK")
</pallas_src>

<mosaic_0001>
module attributes {stable_mosaic.version = 11 : i64} {
  func.func @_conv_stats_kernel(%arg0: i32, %arg1: i32, %arg2: memref<1x8x256xbf16, #tpu.memory_space<vmem>>, %arg3: memref<8x24xbf16, #tpu.memory_space<vmem>>, %arg4: memref<8x1xf32, #tpu.memory_space<vmem>>, %arg5: memref<1x1x8x2xf32, #tpu.memory_space<vmem>>) attributes {dimension_semantics = [#tpu.dimension_semantics<parallel>, #tpu.dimension_semantics<arbitrary>], iteration_bounds = array<i64: 2, 1>, scalar_prefetch = 0 : i64, scratch_operands = 0 : i64, tpu.core_type = #tpu.core_type<tc>, window_params = [{transform_indices = @transform_0, window_bounds = array<i64: 1, 8, 256>}, {pipeline_mode = #tpu.pipeline_mode<synchronous>, transform_indices = @transform_1, window_bounds = array<i64: 8, 24>}, {pipeline_mode = #tpu.pipeline_mode<synchronous>, transform_indices = @transform_2, window_bounds = array<i64: 8, 1>}, {transform_indices = @transform_3, window_bounds = array<i64: 1, 1, 8, 2>}]} {
    %c0 = arith.constant 0 : index
    %c0_0 = arith.constant 0 : index
    %c0_1 = arith.constant 0 : index
    %0 = vector.load %arg2[%c0, %c0_0, %c0_1] : memref<1x8x256xbf16, #tpu.memory_space<vmem>>, vector<1x8x128xbf16>
    %1 = vector.shape_cast %0 : vector<1x8x128xbf16> to vector<8x128xbf16>
    %c0_2 = arith.constant 0 : index
    %c0_3 = arith.constant 0 : index
    %c1 = arith.constant 1 : index
    %2 = vector.load %arg2[%c0_2, %c0_3, %c1] : memref<1x8x256xbf16, #tpu.memory_space<vmem>>, vector<1x8x128xbf16>
    %3 = vector.shape_cast %2 : vector<1x8x128xbf16> to vector<8x128xbf16>
    %c0_4 = arith.constant 0 : index
    %c0_5 = arith.constant 0 : index
    %c2 = arith.constant 2 : index
    %4 = vector.load %arg2[%c0_4, %c0_5, %c2] : memref<1x8x256xbf16, #tpu.memory_space<vmem>>, vector<1x8x128xbf16>
    %5 = vector.shape_cast %4 : vector<1x8x128xbf16> to vector<8x128xbf16>
    %6 = tpu.concatenate %1, %3, %5 in 0 : vector<8x128xbf16>, vector<8x128xbf16>, vector<8x128xbf16> -> vector<24x128xbf16>
    %c0_6 = arith.constant 0 : index
    %c0_7 = arith.constant 0 : index
    %7 = vector.load %arg3[%c0_6, %c0_7] : memref<8x24xbf16, #tpu.memory_space<vmem>>, vector<8x24xbf16>
    %cst = arith.constant dense<0.000000e+00> : vector<8x128xf32>
    %8 = tpu.matmul %7, %6, %cst {dimension_numbers = #tpu.dot_dimension_numbers<[1], [0], [0], [1], [0, 0, 1, 1], [], []>} : vector<8x24xbf16>, vector<24x128xbf16>, vector<8x128xf32> -> vector<8x128xf32>
    %c0_8 = arith.constant 0 : index
    %c0_9 = arith.constant 0 : index
    %9 = vector.load %arg4[%c0_8, %c0_9] : memref<8x1xf32, #tpu.memory_space<vmem>>, vector<8x1xf32>
    %10 = vector.broadcast %9 : vector<8x1xf32> to vector<8x128xf32>
    %11 = arith.addf %8, %10 : vector<8x128xf32>
    %cst_10 = arith.constant 0.000000e+00 : f32
    %12 = vector.broadcast %cst_10 : f32 to vector<8x128xf32>
    %13 = arith.cmpf oge, %11, %12 : vector<8x128xf32>
    %cst_11 = arith.constant 0.00999999977 : f32
    %14 = vector.broadcast %cst_11 : f32 to vector<8x128xf32>
    %15 = arith.mulf %14, %11 : vector<8x128xf32>
    %16 = arith.select %13, %11, %15 : vector<8x128xi1>, vector<8x128xf32>
    %17 = tpu.iota {dimensions = array<i32: 1>} : vector<8x128xi32>
    %c16_i32 = arith.constant 16 : i32
    %18 = vector.broadcast %c16_i32 : i32 to vector<8x128xi32>
    %19 = arith.cmpi slt, %17, %18 : vector<8x128xi32>
    %cst_12 = arith.constant 0.000000e+00 : f32
    %20 = vector.broadcast %cst_12 : f32 to vector<8x128xf32>
    %21 = arith.select %19, %16, %20 : vector<8x128xi1>, vector<8x128xf32>
    %cst_13 = arith.constant dense<0.000000e+00> : vector<8xf32>
    %22 = vector.multi_reduction <add>, %21, %cst_13 [1] : vector<8x128xf32> to vector<8xf32>
    %23 = vector.shape_cast %22 : vector<8xf32> to vector<8x1xf32>
    %c0_14 = arith.constant 0 : index
    %c0_15 = arith.constant 0 : index
    %c0_16 = arith.constant 0 : index
    %c0_17 = arith.constant 0 : index
    %24 = vector.load %arg5[%c0_14, %c0_15, %c0_16, %c0_17] : memref<1x1x8x2xf32, #tpu.memory_space<vmem>>, vector<1x1x8x1xf32>
    %25 = vector.shape_cast %24 : vector<1x1x8x1xf32> to vector<8x1xf32>
    %26 = vector.shape_cast %23 : vector<8x1xf32> to vector<1x1x8x1xf32>
    tpu.vector_store %arg5[%c0_14, %c0_15, %c0_16, %c0_17], %26 {strides = array<i32>} : memref<1x1x8x2xf32, #tpu.memory_space<vmem>>, vector<1x1x8x1xf32>,
    %27 = arith.mulf %21, %21 : vector<8x128xf32>
    %cst_18 = arith.constant dense<0.000000e+00> : vector<8xf32>
    %28 = vector.multi_reduction <add>, %27, %cst_18 [1] : vector<8x128xf32> to vector<8xf32>
    %29 = vector.shape_cast %28 : vector<8xf32> to vector<8x1xf32>
    %c0_19 = arith.constant 0 : index
    %c0_20 = arith.constant 0 : index
    %c0_21 = arith.constant 0 : index
    %c1_22 = arith.constant 1 : index
    %30 = vector.load %arg5[%c0_19, %c0_20, %c0_21, %c1_22] : memref<1x1x8x2xf32, #tpu.memory_space<vmem>>, vector<1x1x8x1xf32>
    %31 = vector.shape_cast %30 : vector<1x1x8x1xf32> to vector<8x1xf32>
    %32 = vector.shape_cast %29 : vector<8x1xf32> to vector<1x1x8x1xf32>
    tpu.vector_store %arg5[%c0_19, %c0_20, %c0_21, %c1_22], %32 {strides = array<i32>} : memref<1x1x8x2xf32, #tpu.memory_space<vmem>>, vector<1x1x8x1xf32>,
    return
  }
  func.func @transform_0(%arg0: i32, %arg1: i32) -> (i32, i32, i32) {
    %c0_i32 = arith.constant 0 : i32
    %c0_i32_0 = arith.constant 0 : i32
    %c0_i32_1 = arith.constant 0 : i32
    return %arg0, %c0_i32, %c0_i32_0 : i32, i32, i32
  }
  func.func @transform_1(%arg0: i32, %arg1: i32) -> (i32, i32) {
    %c0_i32 = arith.constant 0 : i32
    %c0_i32_0 = arith.constant 0 : i32
    %c0_i32_1 = arith.constant 0 : i32
    return %c0_i32, %c0_i32_0 : i32, i32
  }
  func.func @transform_2(%arg0: i32, %arg1: i32) -> (i32, i32) {
    %c0_i32 = arith.constant 0 : i32
    %c0_i32_0 = arith.constant 0 : i32
    %c0_i32_1 = arith.constant 0 : i32
    return %c0_i32, %c0_i32_0 : i32, i32
  }
  func.func @transform_3(%arg0: i32, %arg1: i32) -> (i32, i32, i32, i32) {
    %c0_i32 = arith.constant 0 : i32
    %c0_i32_0 = arith.constant 0 : i32
    %c0_i32_1 = arith.constant 0 : i32
    return %arg0, %arg1, %c0_i32, %c0_i32_0 : i32, i32, i32, i32
  }
}

</mosaic_0001>

<bundles_post_ra>
// kernel: tpu_custom_call.1
= control target key start
LH: loop header
LB: loop body
LE: loop exit
PB: predicated region body
PF: predicated region fallthrough
CT: control target
= control target key end

     0   :  { %8 = vsyncpa [#allocation3], 0  ;;  %s694_s0 = inlined_call_operand.hbm [shape: bf16[2,8,256], index: 0, kind: input, shape index: {}]   ;;  %s695_s1 = inlined_call_operand.vmem [shape: bf16[8,24], index: 1, kind: input, shape index: {}]   ;;  %s696_s2 = inlined_call_operand.vmem [shape: f32[8,1], index: 2, kind: input, shape index: {}]   ;;  %s697_s3 = inlined_call_operand.vmem [shape: f32[2,1,8,2], index: 3, kind: output, shape index: {}]  }
   0x1   :  { %10 = vsyncpa [#allocation3 + $0x1], 0  ;;  %s581_s12 = smov 0   ;;  %s583_s13 = smov 0  }
   0x2   :  { %s585_s14 = smov 0   ;;  %s587_s15 = smov 0  }
   0x3   :  { %s589_s16 = smov 0   ;;  %s591_s17 = smov 0  }
   0x4 LB: > { %s385_s18 = sadd.s32 4294967295, %s553_s17   ;;  %s28_s19 = sadd.s32 1, %s549_s16  ;;  %s553_s17 = sphi %s591_s17, %s16_s17   ;;  %s549_s16 = sphi %s589_s16, %s705_s16   ;;  %s545_s15 = sphi %s587_s15, %s704_s15   ;;  %s541_s14 = sphi %s585_s14, %s703_s14   ;;  %s537_s13 = sphi %s583_s13, %s702_s13   ;;  %s533_s12 = sphi %s581_s12, %s701_s12  }
   0x5   : > { %p30_p0 = scmp.ge.s32.totalorder %s28_s19, 2  ;;  %s35_s20 = sadd.s32 1, %s541_s14 }
   0x6   : > { %p42_p1 = scmp.ne.s32.totalorder %s541_s14, %s537_s13  ;;  %p43_p2 = scmp.eq.s32.totalorder %s553_s17, 0 }
   0x7   : > { %s707_s19 = smov (%p30_p0, %s28_s19), 0  ;;  %p48_p4 = scmp.ne.s32.totalorder %s537_s13, %s533_s12 }
   0x8   : > { %p617_p3 = por %p43_p2, %p42_p1  ;;  %s32_s22 = ssub.s32 %s549_s16, %s707_s19 }
   0x9   : > { %p49_p5 = scmp.eq.s32.totalorder %s385_s18, 0  ;;  %p33_p6 = scmp.eq.s32.totalorder %s32_s22, 0 }
   0xa   : > { %p418_p8 = scmp.lt.s32.totalorder %s553_s17, 2  ;;  %s148_s25 = sand.u32 1, %s541_s14  }
   0xb   : > { %p624_p7 = por %p49_p5, %p48_p4  ;;  %s400_s26 = sshll.u32 %s549_s16, 7 }
   0xc   : > { %s630_s24 = scalar_select %p33_p6, %s541_s14, %s35_s20  }
   0xd   : > { %s389_s27 = sshll.u32 %s148_s25, 3  ;;  %s158_s30 = scalar_lea.hbm %s694_s0, %s400_s26 }
   0xe   : > { %s152_s4 = scalar_lea.vmem [#allocation2], %s389_s27  ;;  %p639_p9 = pnand %p418_p8, %p617_p3 }
   0xf   : > { %s160_s5 = sshll.u32 %s152_s4, 4  ;;  %p392_p10 = scmp.ge.s32.totalorder %s553_s17, 1  ;;  %s161_s5 = int_to_ptr.vmem [resolvable:$true] %s160_s5 }
  0x10   : > { %p165_p11 = scmp.lt.s32.totalorder %s553_s17, 3  ;;  %s149_s7 = scalar_lea.sflag [#allocation3], %s148_s25 }
  0x11   : > { %p477_p12 = pneg %p639_p9  ;;  %s488_s8 = scalar_lea.vmem %s161_s5, 128 }
  0x12   : > { %p489_p13 = scmp.ne.s32.totalorder %s161_s5, %s488_s8  ;;  %s555_s9 = smov [#allocation2]  }
  0x13   : > { %s493_s10 = sshll.u32 %s555_s9, 4  ;;  %s494_s10 = int_to_ptr.vmem [resolvable:$false] %s493_s10 }
  0x14   : > { %p491_p0 = pnand %p489_p13, %p477_p12  ;;  %s495_s11 = scalar_lea.vmem %s494_s10, 256 }
  0x15   : > { %p496_p2 = scmp.lt.s32.totalorder %s161_s5, %s494_s10  ;;  %p497_p3 = scmp.lt.s32.totalorder %s495_s11, %s488_s8 }
  0x16   : > { %p492_p1 = pneg %p491_p0 }
  0x17   : > { %p498_p4 = por %p497_p3, %p496_p2 }
  0x19   : > { %p499_p5 = pnand %p498_p4, %p492_p1 }
  0x1b   : > { %502 = shalt.err (!%p499_p5)
}
  0x1c   : > { %417 = dma.hbm_to_vmem [thread:$0]  (!%p639_p9), %s158_s30, 128, %s161_s5, %s149_s7  }
  0x1d   : > { %p166_p6 = pnand %p392_p10, %p165_p11 }
  0x1e   : > { %s171_s12 = sand.u32 (!%p166_p6), 1, %s537_s13  }
  0x1f   : > { %169 = sbr.rel (%p166_p6) target bundleno = 508 (0x1fc), region = 32  ;;  %s654_s18 = sshll.u32 (!%p166_p6), %s171_s12, 3 }
  0x20   : > { %s172_s20 = scalar_lea.sflag (!%p166_p6), [#allocation3], %s171_s12  ;;  %s175_s21 = scalar_lea.vmem (!%p166_p6), [#allocation2], %s654_s18 }
  0x24   : > { %528 = dma.done.wait (%p624_p7), %s172_s20, 128  }
  0x25   : > { %530 = vsyncadd (%p624_p7), %s172_s20, 4294967168  ;;  %v556_v0 = vmov 0.0   ;;  %v209_v1 = vld [vmem:[%s175_s21] sm:$0xff]  ;;  %vm557_vm0 = vmmov 0   ;;  %s558_s22 = smov 127   ;;  %s559_s25 = smov 126   ;;  %v289_v16 = vlaneseq }
  0x26   : > { %404 = vmatprep.subr.bf16.mxu0 %v556_v0  ;;  %v395_v2 = vcombine.low %v209_v1, %v209_v1  ;;  %408 = vmatprep.mubr.msk.bf16.mxu0 %vm557_vm0, %v556_v0  ;;  %v396_v3 = vcombine.high %v209_v1, %v209_v1  ;;  %v560_v4 = vmov 0   ;;  %v233_v5 = vld [vmem:[%s696_s2] sm:$0xff]  ;;  %vm225_vm1 = vcmask 1031168   ;;  %p200_p7 = scmp.lt.s32.totalorder %s545_s15, 1 }
  0x27   : > { %472 = vset.pattern.permute.xlu0 %v560_v4  ;;  %vm227_vm2 = vcmask 1043456   ;;  %vm219_vm3 = vcmask 1039360   ;;  %v208_v13 = vld [vmem:[%s175_s21] sm:$0xf]  ;;  %vm239_vm4 = vcmask 195584   ;;  %v290_v18 = vand.u32 127, %v289_v16 }
  0x28   : > { %215 = vrot.lane.b32.xlu1 %v395_v2, %s558_s22  ;;  %221 = vrot.lane.b32.xlu0 %v395_v2, %s559_s25  ;;  %v232_v15 = vld [vmem:[%s695_s1] sm:$0xf]  ;;  %s709_s15 = smov (!%p200_p7, %s545_s15), 1  ;;  %vm295_vm7 = vcmask 7168   ;;  %vm300_vm8 = vcmask 15368  }
  0x29   : > { %vm291_vm6 = vcmp.lt.s32.totalorder %v290_v18, 16  ;;  %s394_s29 = sshll.u32 %s709_s15, 3 }
  0x2a   : > { %s206_s5 = scalar_lea.vmem %s697_s3, %s394_s29 }
  0x2c   : > { %217 = vrot.lane.b32.xlu1 %v396_v3, %s558_s22  ;;  %223 = vrot.lane.b32.xlu0 %v396_v3, %s559_s25 }
  0x30   : > { %236 = vperm.xlu0 %472, %v233_v5  }
  0x9a   : > { %v216_v6 = vpop.permute.xlu1 %215  ;;  %v222_v7 = vpop.permute.xlu0 %221 }
  0x9e   : > { %v218_v8 = vpop.permute.xlu1 %217  ;;  %v224_v9 = vpop.permute.xlu0 %223 }
  0x9f   : > { %v226_v10 = vsel %vm225_vm1, %v222_v7, %v224_v9  ;;  %v220_v12 = vsel %vm219_vm3, %v216_v6, %v218_v8 }
  0xa0   : > { %v244_v11 = vsel %vm227_vm2, %v226_v10, 0  ;;  %v230_v14 = vsel %vm227_vm2, %v208_v13, %v220_v12 }
  0xa1   : > { %405 = vmatpush3.bf16.msra.mxu0 %v244_v11 }
  0xa2   : > { %406 = vmatprep.subr.bf16.mxu0 %v556_v0 }
  0xa5   : > { %407 = vmatpush3.bf16.msra.mxu0 %v230_v14 }
  0xa8   : > { %409 = vmatmul.mubr.msk.bf16.vlgmr.msra.gmra.mxu0 %vm239_vm4, %v232_v15 }
  0xab   : > { %v237_v17 = vpop.permute.xlu0 %236 }
 0x168   : > { %v280_v19 = vpop.f32.mrf.mxu0 }
 0x169   : > { %v281_v20 = vadd.f32 %v280_v19, %v237_v17 }
 0x16a   : > { %v410_v21 = vpop.f32.mrf.mxu0 }
 0x16b   : > { %v287_v22 = vmul.f32 0.01, %v281_v20  ;;  %vm286_vm5 = vcmp.ge.f32.partialorder %v281_v20, 0.0 }
 0x16c   : > { %v283_v23 = vpop.f32.mrf.mxu0 }
 0x16d   : > { %v288_v24 = vsel %vm286_vm5, %v281_v20, %v287_v22 }
 0x16e   : > { %v411_v25 = vpop.f32.mrf.mxu0  ;;  %v292_v26 = vsel %vm291_vm6, %v288_v24, 0.0 }
 0x16f   : > { %293 = vadd.xlane.f32.xlu1 %v292_v26  ;;  %v297_v27 = vmul.f32 %v292_v26, %v292_v26 }
 0x171   : > { %298 = vadd.xlane.f32.xlu0 %v297_v27 }
 0x1f8   : > { %v294_v28 = vpop.xlane.xlu1 %293 }
 0x1f9   : > { %296 = vst.msk [vmem:[%s206_s5] sm:$0xff] %vm295_vm7, %v294_v28 }
 0x1fa   : > { %v299_v29 = vpop.xlane.xlu0 %298 }
 0x1fb   : > { %301 = vst.msk [vmem:[%s206_s5] sm:$0xff] %vm300_vm8, %v299_v29 }
 0x1fc PF: > { %s16_s17 = sadd.s32 1, %s553_s17   ;;  %s701_s12 = smov %s537_s13 }
 0x1fd   : > { %p13_p8 = scmp.ge.s32.totalorder %s16_s17, 4   ;;  %s702_s13 = smov %s541_s14 }
 0x1fe   : > { %s703_s14 = smov %s630_s24  ;;  %s704_s15 = smov %s549_s16 }
 0x1ff   : > { %s705_s16 = smov %s707_s19  ;;  %15 = sbr.rel (!%p13_p8) target bundleno = 4 (0x4), region = 72 }
 0x204   :  { %327 = vsyncpa [#allocation3], 1 }
 0x205   :  { %329 = vsyncpa [#allocation3 + $0x1], 1 }

</bundles_post_ra>
